<compile_context>
chip_gen: v6e
topology: v6e:2x2x1
jax: 0.10.0
libtpu: 0.0.40
codegen_flags: <defaults>
</compile_context>

<pallas_src>
import jax
import jax.numpy as jnp
from jax.experimental import pallas as pl
from jax.experimental.pallas import tpu as pltpu

_SUBLANE = 8


def _round_up(n, m):
    return ((n + m - 1) // m) * m


def _sigmoid(x):
    # sigmoid(x) = 0.5*tanh(0.5*x) + 0.5 : tanh runs on the EUP (its own bundle
    # slot); the mul/adds are cheap VPU ops. Mathematically exact.
    return 0.5 * jnp.tanh(0.5 * x) + 0.5


def discriminator_kernel(x_ref, w1_ref, b1_ref, w2_ref, b2_ref, w3_ref, b3_ref,
                         o_ref):
    """Fused 3-layer MLP forward on one (tm, input_size) batch tile.

    Weights arrive pre-transposed to (in, out), so every matmul is a plain
    row-major A@B contraction on the MXU. Rows are independent, so any garbage
    in the ragged last batch block only affects rows whose stores are masked.
    """
    h = jnp.dot(x_ref[...], w1_ref[...], preferred_element_type=jnp.float32)
    h = _sigmoid(h + b1_ref[...])

    h = jnp.dot(h, w2_ref[...], preferred_element_type=jnp.float32)
    h = _sigmoid(h + b2_ref[...])

    h = jnp.dot(h, w3_ref[...], preferred_element_type=jnp.float32)
    h = _sigmoid(h + b3_ref[...])

    o_ref[...] = h.astype(o_ref.dtype)


def _default_vmem_budget():
    # Generation-aware: ~half of physical VMEM, capped at 64 MiB.
    # v5e/v6e (128 MiB) -> 64 MiB budget; v7x (64 MiB) -> 32 MiB budget.
    try:
        cap = pltpu.get_tpu_info().vmem_capacity_bytes
    except Exception:
        cap = 64 * 1024 * 1024
    return max(16 * 1024 * 1024, min(cap // 2, 64 * 1024 * 1024))


def discriminator_forward(x, params, *, tile_m=1024, vmem_budget_bytes=None):
    """Batch-tiled fused forward. Returns (B, output_size) float32."""
    (w1, b1), (w2, b2), (w3, b3) = params
    B, in_size = x.shape
    hid_size = w1.shape[0]
    out_size = w3.shape[0]

    if vmem_budget_bytes is None:
        vmem_budget_bytes = _default_vmem_budget()

    # One-time wrapper transpose of the tiny, grid-invariant weights to (in, out)
    # so the kernel never relayouts the RHS per grid step. Biases become (1, N).
    w1t = jnp.asarray(w1, jnp.float32).T          # (in_size,  hid_size)
    w2t = jnp.asarray(w2, jnp.float32).T          # (hid_size, out_size)
    w3t = jnp.asarray(w3, jnp.float32).T          # (out_size, out_size)
    b1r = jnp.asarray(b1, jnp.float32).reshape(1, hid_size)
    b2r = jnp.asarray(b2, jnp.float32).reshape(1, out_size)
    b3r = jnp.asarray(b3, jnp.float32).reshape(1, out_size)

    # --- Batch tile sizing ---------------------------------------------------
    # Cap tm so the grid has >=2 steps when the batch allows it (lights up both
    # TensorCores on v7x via the "parallel" grid axis); round to the 8-sublane
    # granularity.
    tm = min(tile_m, _round_up(B, _SUBLANE), _round_up(pl.cdiv(B, 2), _SUBLANE))
    tm = max(_SUBLANE, _round_up(tm, _SUBLANE))

    # VMEM accounting: weights may be double-buffered by the pipeline (budget 2x),
    # x/out tiles are double-buffered, plus f32 intermediates for the activations.
    weight_bytes = 4 * (in_size * hid_size + hid_size * out_size +
                        out_size * out_size + hid_size + 2 * out_size)

    def vmem_need(t):
        act = 2 * 4 * t * (in_size + out_size)          # double-buffered I/O tiles
        interm = 4 * t * (hid_size + 2 * out_size)       # in-kernel intermediates
        return 2 * weight_bytes + act + interm

    while tm > _SUBLANE and vmem_need(tm) > vmem_budget_bytes:
        tm = _round_up(max(_SUBLANE, tm // 2), _SUBLANE)
    # TODO(synk): if the resident weights alone exceed the VMEM budget (very large
    # input/hidden sizes), a K/N-tiled variant would be needed; not the case here.

    grid = (pl.cdiv(B, tm),)

    # Activations: tiled over the batch, full (unpadded) feature dim.
    x_spec = pl.BlockSpec((tm, in_size), lambda i: (i, 0))
    o_spec = pl.BlockSpec((tm, out_size), lambda i: (i, 0))
    # Weights/biases: whole array, constant block index -> VMEM-resident.
    res_spec = lambda shape: pl.BlockSpec(shape, lambda i: (0, 0))

    cost = pl.CostEstimate(
        flops=2 * B * (in_size * hid_size + hid_size * out_size +
                       out_size * out_size),
        transcendentals=B * (hid_size + 2 * out_size),
        bytes_accessed=4 * B * (in_size + out_size) + weight_bytes,
    )

    out = pl.pallas_call(
        discriminator_kernel,
        grid=grid,
        in_specs=[
            x_spec,
            res_spec((in_size, hid_size)), res_spec((1, hid_size)),
            res_spec((hid_size, out_size)), res_spec((1, out_size)),
            res_spec((out_size, out_size)), res_spec((1, out_size)),
        ],
        out_specs=o_spec,
        out_shape=jax.ShapeDtypeStruct((B, out_size), jnp.float32),
        compiler_params=pltpu.CompilerParams(
            dimension_semantics=("parallel",),
            vmem_limit_bytes=int(vmem_budget_bytes),
        ),
        cost_estimate=cost,
    )(x, w1t, b1r, w2t, b2r, w3t, b3r)

    return out


def init_params(key, input_size, hidden_size, output_size):
    """Deterministic synthetic init matching nn.Linear parameter shapes."""
    keys = jax.random.split(key, 6)

    def linear(kw, kb, fan_in, fan_out):
        bound = 1.0 / jnp.sqrt(fan_in)
        w = jax.random.uniform(kw, (fan_out, fan_in), jnp.float32, -bound, bound)
        b = jax.random.uniform(kb, (fan_out,), jnp.float32, -bound, bound)
        return w, b

    p1 = linear(keys[0], keys[1], input_size, hidden_size)
    p2 = linear(keys[2], keys[3], hidden_size, output_size)
    p3 = linear(keys[4], keys[5], output_size, output_size)
    return (p1, p2, p3)


def reference_forward(x, params):
    """Pure-JAX reference of the PyTorch forward for verification."""
    (w1, b1), (w2, b2), (w3, b3) = params
    h = jax.nn.sigmoid(x @ w1.T + b1)
    h = jax.nn.sigmoid(h @ w2.T + b2)
    h = jax.nn.sigmoid(h @ w3.T + b3)
    return h


if __name__ == "__main__":
    # Small shapes consistent with the module's MLP forward.
    batch = 8
    input_size = 16
    hidden_size = 32
    output_size = 8

    key = jax.random.PRNGKey(0)
    kx, kp, kx2 = jax.random.split(key, 3)

    x = jax.random.normal(kx, (batch, input_size), dtype=jnp.float32)
    params = init_params(kp, input_size, hidden_size, output_size)

    out = jax.block_until_ready(discriminator_forward(x, params))
    ref = reference_forward(x, params)
    assert out.shape == (batch, output_size)
    assert jnp.allclose(out, ref, atol=1e-5, rtol=1e-5), "mismatch vs reference"

    # Exercise the multi-step grid + ragged last batch block (40 = 16+16+8).
    x2 = jax.random.normal(kx2, (40, input_size), dtype=jnp.float32)
    out2 = jax.block_until_ready(discriminator_forward(x2, params, tile_m=16))
    ref2 = reference_forward(x2, params)
    assert out2.shape == (40, output_size)
    assert jnp.allclose(out2, ref2, atol=1e-5, rtol=1e-5), "mismatch (tiled)"

    print("KERNEL_OK")
</pallas_src>

<mosaic_0001>
module attributes {stable_mosaic.version = 11 : i64} {
  func.func @discriminator_kernel(%arg0: i32, %arg1: memref<8x16xf32, #tpu.memory_space<vmem>>, %arg2: memref<16x32xf32, #tpu.memory_space<vmem>>, %arg3: memref<1x32xf32, #tpu.memory_space<vmem>>, %arg4: memref<32x8xf32, #tpu.memory_space<vmem>>, %arg5: memref<1x8xf32, #tpu.memory_space<vmem>>, %arg6: memref<8x8xf32, #tpu.memory_space<vmem>>, %arg7: memref<1x8xf32, #tpu.memory_space<vmem>>, %arg8: memref<8x8xf32, #tpu.memory_space<vmem>>) attributes {dimension_semantics = [#tpu.dimension_semantics<parallel>], iteration_bounds = array<i64: 1>, scalar_prefetch = 0 : i64, scratch_operands = 0 : i64, tpu.core_type = #tpu.core_type<tc>, window_params = [{transform_indices = @transform_0, window_bounds = array<i64: 8, 16>}, {pipeline_mode = #tpu.pipeline_mode<synchronous>, transform_indices = @transform_1, window_bounds = array<i64: 16, 32>}, {pipeline_mode = #tpu.pipeline_mode<synchronous>, transform_indices = @transform_2, window_bounds = array<i64: 1, 32>}, {pipeline_mode = #tpu.pipeline_mode<synchronous>, transform_indices = @transform_3, window_bounds = array<i64: 32, 8>}, {pipeline_mode = #tpu.pipeline_mode<synchronous>, transform_indices = @transform_4, window_bounds = array<i64: 1, 8>}, {pipeline_mode = #tpu.pipeline_mode<synchronous>, transform_indices = @transform_5, window_bounds = array<i64: 8, 8>}, {pipeline_mode = #tpu.pipeline_mode<synchronous>, transform_indices = @transform_6, window_bounds = array<i64: 1, 8>}, {transform_indices = @transform_7, window_bounds = array<i64: 8, 8>}]} {
    %c0 = arith.constant 0 : index
    %c0_0 = arith.constant 0 : index
    %0 = vector.load %arg1[%c0, %c0_0] : memref<8x16xf32, #tpu.memory_space<vmem>>, vector<8x16xf32>
    %c0_1 = arith.constant 0 : index
    %c0_2 = arith.constant 0 : index
    %1 = vector.load %arg2[%c0_1, %c0_2] : memref<16x32xf32, #tpu.memory_space<vmem>>, vector<16x32xf32>
    %cst = arith.constant dense<0.000000e+00> : vector<8x32xf32>
    %2 = tpu.matmul %0, %1, %cst {dimension_numbers = #tpu.dot_dimension_numbers<[1], [0], [0], [1], [0, 0, 1, 1], [], []>} : vector<8x16xf32>, vector<16x32xf32>, vector<8x32xf32> -> vector<8x32xf32>
    %c0_3 = arith.constant 0 : index
    %c0_4 = arith.constant 0 : index
    %3 = vector.load %arg3[%c0_3, %c0_4] : memref<1x32xf32, #tpu.memory_space<vmem>>, vector<1x32xf32>
    %4 = vector.broadcast %3 : vector<1x32xf32> to vector<8x32xf32>
    %5 = arith.addf %2, %4 : vector<8x32xf32>
    %cst_5 = arith.constant 5.000000e-01 : f32
    %6 = vector.broadcast %cst_5 : f32 to vector<8x32xf32>
    %7 = arith.mulf %6, %5 : vector<8x32xf32>
    %8 = math.tanh %7 : vector<8x32xf32>
    %cst_6 = arith.constant 5.000000e-01 : f32
    %9 = vector.broadcast %cst_6 : f32 to vector<8x32xf32>
    %10 = arith.mulf %9, %8 : vector<8x32xf32>
    %cst_7 = arith.constant 5.000000e-01 : f32
    %11 = vector.broadcast %cst_7 : f32 to vector<8x32xf32>
    %12 = arith.addf %10, %11 : vector<8x32xf32>
    %c0_8 = arith.constant 0 : index
    %c0_9 = arith.constant 0 : index
    %13 = vector.load %arg4[%c0_8, %c0_9] : memref<32x8xf32, #tpu.memory_space<vmem>>, vector<32x8xf32>
    %cst_10 = arith.constant dense<0.000000e+00> : vector<8x8xf32>
    %14 = tpu.matmul %12, %13, %cst_10 {dimension_numbers = #tpu.dot_dimension_numbers<[1], [0], [0], [1], [0, 0, 1, 1], [], []>} : vector<8x32xf32>, vector<32x8xf32>, vector<8x8xf32> -> vector<8x8xf32>
    %c0_11 = arith.constant 0 : index
    %c0_12 = arith.constant 0 : index
    %15 = vector.load %arg5[%c0_11, %c0_12] : memref<1x8xf32, #tpu.memory_space<vmem>>, vector<1x8xf32>
    %16 = vector.broadcast %15 : vector<1x8xf32> to vector<8x8xf32>
    %17 = arith.addf %14, %16 : vector<8x8xf32>
    %cst_13 = arith.constant 5.000000e-01 : f32
    %18 = vector.broadcast %cst_13 : f32 to vector<8x8xf32>
    %19 = arith.mulf %18, %17 : vector<8x8xf32>
    %20 = math.tanh %19 : vector<8x8xf32>
    %cst_14 = arith.constant 5.000000e-01 : f32
    %21 = vector.broadcast %cst_14 : f32 to vector<8x8xf32>
    %22 = arith.mulf %21, %20 : vector<8x8xf32>
    %cst_15 = arith.constant 5.000000e-01 : f32
    %23 = vector.broadcast %cst_15 : f32 to vector<8x8xf32>
    %24 = arith.addf %22, %23 : vector<8x8xf32>
    %c0_16 = arith.constant 0 : index
    %c0_17 = arith.constant 0 : index
    %25 = vector.load %arg6[%c0_16, %c0_17] : memref<8x8xf32, #tpu.memory_space<vmem>>, vector<8x8xf32>
    %cst_18 = arith.constant dense<0.000000e+00> : vector<8x8xf32>
    %26 = tpu.matmul %24, %25, %cst_18 {dimension_numbers = #tpu.dot_dimension_numbers<[1], [0], [0], [1], [0, 0, 1, 1], [], []>} : vector<8x8xf32>, vector<8x8xf32>, vector<8x8xf32> -> vector<8x8xf32>
    %c0_19 = arith.constant 0 : index
    %c0_20 = arith.constant 0 : index
    %27 = vector.load %arg7[%c0_19, %c0_20] : memref<1x8xf32, #tpu.memory_space<vmem>>, vector<1x8xf32>
    %28 = vector.broadcast %27 : vector<1x8xf32> to vector<8x8xf32>
    %29 = arith.addf %26, %28 : vector<8x8xf32>
    %cst_21 = arith.constant 5.000000e-01 : f32
    %30 = vector.broadcast %cst_21 : f32 to vector<8x8xf32>
    %31 = arith.mulf %30, %29 : vector<8x8xf32>
    %32 = math.tanh %31 : vector<8x8xf32>
    %cst_22 = arith.constant 5.000000e-01 : f32
    %33 = vector.broadcast %cst_22 : f32 to vector<8x8xf32>
    %34 = arith.mulf %33, %32 : vector<8x8xf32>
    %cst_23 = arith.constant 5.000000e-01 : f32
    %35 = vector.broadcast %cst_23 : f32 to vector<8x8xf32>
    %36 = arith.addf %34, %35 : vector<8x8xf32>
    %c0_24 = arith.constant 0 : index
    %c0_25 = arith.constant 0 : index
    %37 = vector.load %arg8[%c0_24, %c0_25] : memref<8x8xf32, #tpu.memory_space<vmem>>, vector<8x8xf32>
    tpu.vector_store %arg8[%c0_24, %c0_25], %36 {strides = array<i32>} : memref<8x8xf32, #tpu.memory_space<vmem>>, vector<8x8xf32>,
    return
  }
  func.func @transform_0(%arg0: i32) -> (i32, i32) {
    %c0_i32 = arith.constant 0 : i32
    %c0_i32_0 = arith.constant 0 : i32
    return %arg0, %c0_i32 : i32, i32
  }
  func.func @transform_1(%arg0: i32) -> (i32, i32) {
    %c0_i32 = arith.constant 0 : i32
    %c0_i32_0 = arith.constant 0 : i32
    %c0_i32_1 = arith.constant 0 : i32
    return %c0_i32, %c0_i32_0 : i32, i32
  }
  func.func @transform_2(%arg0: i32) -> (i32, i32) {
    %c0_i32 = arith.constant 0 : i32
    %c0_i32_0 = arith.constant 0 : i32
    %c0_i32_1 = arith.constant 0 : i32
    return %c0_i32, %c0_i32_0 : i32, i32
  }
  func.func @transform_3(%arg0: i32) -> (i32, i32) {
    %c0_i32 = arith.constant 0 : i32
    %c0_i32_0 = arith.constant 0 : i32
    %c0_i32_1 = arith.constant 0 : i32
    return %c0_i32, %c0_i32_0 : i32, i32
  }
  func.func @transform_4(%arg0: i32) -> (i32, i32) {
    %c0_i32 = arith.constant 0 : i32
    %c0_i32_0 = arith.constant 0 : i32
    %c0_i32_1 = arith.constant 0 : i32
    return %c0_i32, %c0_i32_0 : i32, i32
  }
  func.func @transform_5(%arg0: i32) -> (i32, i32) {
    %c0_i32 = arith.constant 0 : i32
    %c0_i32_0 = arith.constant 0 : i32
    %c0_i32_1 = arith.constant 0 : i32
    return %c0_i32, %c0_i32_0 : i32, i32
  }
  func.func @transform_6(%arg0: i32) -> (i32, i32) {
    %c0_i32 = arith.constant 0 : i32
    %c0_i32_0 = arith.constant 0 : i32
    %c0_i32_1 = arith.constant 0 : i32
    return %c0_i32, %c0_i32_0 : i32, i32
  }
  func.func @transform_7(%arg0: i32) -> (i32, i32) {
    %c0_i32 = arith.constant 0 : i32
    %c0_i32_0 = arith.constant 0 : i32
    return %arg0, %c0_i32 : i32, i32
  }
}

</mosaic_0001>

<bundles_post_ra>
// kernel: tpu_custom_call.1
= control target key start
LH: loop header
LB: loop body
LE: loop exit
PB: predicated region body
PF: predicated region fallthrough
CT: control target
= control target key end

     0   :  { %v375_v1 = vmov 0.0   ;;  %vm376_vm0 = vmmov 0   ;;  %s454_s0 = inlined_call_operand.vmem [shape: f32[8,16], index: 0, kind: input, shape index: {}]   ;;  %s455_s1 = inlined_call_operand.vmem [shape: f32[16,32], index: 1, kind: input, shape index: {}]   ;;  %s456_s2 = inlined_call_operand.vmem [shape: f32[1,32], index: 2, kind: input, shape index: {}]   ;;  %s457_s3 = inlined_call_operand.vmem [shape: f32[32,8], index: 3, kind: input, shape index: {}]   ;;  %s458_s4 = inlined_call_operand.vmem [shape: f32[1,8], index: 4, kind: input, shape index: {}]   ;;  %s459_s5 = inlined_call_operand.vmem [shape: f32[8,8], index: 5, kind: input, shape index: {}]   ;;  %s460_s6 = inlined_call_operand.vmem [shape: f32[1,8], index: 6, kind: input, shape index: {}]   ;;  %s461_s7 = inlined_call_operand.hbm [shape: f32[8,8], index: 7, kind: output, shape index: {}]  }
   0x1   :  { %v29_v0 = vld [vmem:[%s455_s1 + $0x8] sm:$0xff]  ;;  %321 = vmatprep.subr.mxu0 %v375_v1  ;;  %v28_v2 = vld [vmem:[%s455_s1] sm:$0xff]  ;;  %325 = vmatprep.mubr.msk.f32.mxu0 %vm376_vm0, %v375_v1 }
   0x2   :  { %12 = vsyncpa [#allocation3], 0  ;;  %322 = vmatpush3.msra.mxu0 %v29_v0  ;;  %v27_v3 = vld [vmem:[%s454_s0] sm:$0xff]  ;;  %vm37_vm1 = vcmask 130048   ;;  %328 = vmatprep.subr.mxu1 %v375_v1  ;;  %v118_v4 = vld [vmem:[%s457_s3 + $0x18] sm:$0xff]  ;;  %vm126_vm2 = vcmask 261120  }
   0x3   :  { %323 = vmatprep.subr.mxu0 %v375_v1  ;;  %336 = vmatprep.mubr.msk.f32.mxu1 %vm376_vm0, %v375_v1  ;;  %v117_v5 = vld [vmem:[%s457_s3 + $0x10] sm:$0xff]  ;;  %v116_v6 = vld [vmem:[%s457_s3 + $0x8] sm:$0xff]  ;;  %v115_v7 = vld [vmem:[%s457_s3] sm:$0xff]  ;;  %vm212_vm3 = vcmask 64512  }
   0x4   :  { %324 = vmatpush3.msra.mxu0 %v28_v2  ;;  %329 = vmatpush3.msra.mxu1 %v118_v4  ;;  %v305_v8 = vld [vmem:[%s456_s2] ss:$0 sm:$0xff] }
   0x5   :  { %326 = vmatmul.mubr.msk.f32.vlgmr.msra.gmra.mxu0 %vm37_vm1, %v27_v3  ;;  %339 = vmatprep.subr.mxu0 %v375_v1  ;;  %v204_v16 = vld [vmem:[%s459_s5] sm:$0xff] }
   0x6   :  { %341 = vmatprep.mubr.msk.f32.mxu0 %vm376_vm0, %v375_v1  ;;  %330 = vmatprep.subr.mxu1 %v375_v1  ;;  %v307_v17 = vld [vmem:[%s458_s4] ss:$0 sm:$0xff]  ;;  %s377_s4 = smov [#allocation2]  }
   0x7   :  { %331 = vmatpush3.msra.mxu1 %v117_v5  ;;  %340 = vmatpush3.msra.mxu0 %v204_v16  ;;  %v309_v25 = vld [vmem:[%s460_s6] ss:$0 sm:$0xff]  ;;  %s297_s5 = sshll.u32 %s377_s4, 4  ;;  %s298_s5 = int_to_ptr.vmem [resolvable:$true] %s297_s5 }
   0x8   :  { %332 = vmatprep.subr.mxu1 %v375_v1  ;;  %s353_s19 = scalar_lea.vmem %s298_s5, 128  ;;  %p358_p1 = scmp.lt.s32.totalorder %s298_s5, %s298_s5 }
   0x9   :  { %333 = vmatpush3.msra.mxu1 %v116_v6  ;;  %p354_p0 = scmp.ne.s32.totalorder %s298_s5, %s353_s19  ;;  %p359_p2 = scmp.lt.s32.totalorder %s353_s19, %s353_s19 }
   0xa   :  { %334 = vmatprep.subr.mxu1 %v375_v1 }
   0xb   :  { %335 = vmatpush3.msra.mxu1 %v115_v7  ;;  %p360_p3 = por %p359_p2, %p358_p1 }
   0xd   :  { %p361_p4 = pnand %p360_p3, %p354_p0 }
  0xc5   :  { %v107_v9 = vpop.f32.mrf.mxu0 }
  0xc6   :  { %v108_v10 = vadd.f32 %v305_v8, %v107_v9 }
  0xc7   :  { %v327_v11 = vpop.f32.mrf.mxu0 }
  0xc8   :  { %v111_v12 = vmul.f32 0.5, %v108_v10 }
  0xca   :  { %347 = vtanh.f32 %v111_v12 }
  0xd7   :  { %v348_v13 = vpop.eup %347 }
  0xd8   :  { %v113_v14 = vmul.f32 0.5, %v348_v13 }
  0xda   :  { %v114_v15 = vadd.f32 0.5, %v113_v14 }
  0xdc   :  { %337 = vmatmul.mubr.msk.f32.vlgmr.msra.gmra.mxu1 %vm126_vm2, %v114_v15 }
 0x19c   :  { %v196_v18 = vpop.f32.mrf.mxu1 }
 0x19d   :  { %v197_v19 = vadd.f32 %v307_v17, %v196_v18 }
 0x19e   :  { %v338_v20 = vpop.f32.mrf.mxu1 }
 0x19f   :  { %v200_v21 = vmul.f32 0.5, %v197_v19 }
 0x1a1   :  { %349 = vtanh.f32 %v200_v21 }
 0x1ae   :  { %v350_v22 = vpop.eup %349 }
 0x1af   :  { %v202_v23 = vmul.f32 0.5, %v350_v22 }
 0x1b1   :  { %v203_v24 = vadd.f32 0.5, %v202_v23 }
 0x1b3   :  { %342 = vmatmul.mubr.msk.f32.vlgmr.msra.gmra.mxu0 %vm212_vm3, %v203_v24 }
 0x273   :  { %v282_v26 = vpop.f32.mrf.mxu0 }
 0x274   :  { %v283_v27 = vadd.f32 %v309_v25, %v282_v26 }
 0x275   :  { %v343_v28 = vpop.f32.mrf.mxu0 }
 0x276   :  { %v286_v29 = vmul.f32 0.5, %v283_v27 }
 0x278   :  { %351 = vtanh.f32 %v286_v29 }
 0x285   :  { %v352_v30 = vpop.eup %351 }
 0x286   :  { %v288_v31 = vmul.f32 0.5, %v352_v30 }
 0x288   :  { %v289_v32 = vadd.f32 0.5, %v288_v31 }
 0x28a   :  { %290 = vst.msk [vmem:[#allocation2] sm:$0xff] %vm212_vm3, %v289_v32 }
 0x28b   :  { %364 = shalt.err (!%p361_p4)
}
 0x28c   :  { %300 = dma.vmem_to_hbm [thread:$0]  %s298_s5, 128, %s461_s7, [#allocation3]  }
 0x28d   :  { %373 = dma.done.wait [#allocation3], 128  }
 0x28e   :  { %374 = vsyncadd [#allocation3], 4294967168 }
 0x28f   :  { %304 = vsyncpa [#allocation3], 1 }

</bundles_post_ra>
